<compile_context>
chip_gen: v6e
topology: v6e:2x2x1
jax: 0.10.0
libtpu: 0.0.40
codegen_flags: <defaults>
</compile_context>

<pallas_src>
import functools

import jax
import jax.numpy as jnp
from jax.experimental import pallas as pl
from jax.experimental.pallas import tpu as pltpu
from jax.scipy.linalg import block_diag

_EPS = 1e-12
_LOG_2PI = 1.8378770664093453


# ----------------------------- kernel helpers ------------------------------

def _mish(y):
    # PyTorch Mish = y * tanh(softplus(y)), softplus threshold 20.
    # Single-exp identity: tanh(log1p(t)) = t(t+2)/(t(t+2)+2), t = exp(y).
    t = jnp.exp(jnp.minimum(y, 20.0))
    u = t * (t + 2.0)
    return y * (u / (u + 2.0))


def _custom_exp(x):
    # Module's guarded exp(): x<0 -> exp(x);  x>=0 -> 1/(exp(-x)+eps).
    t = jnp.exp(-jnp.abs(x))
    return jnp.where(x < 0.0, t, 1.0 / (t + _EPS))


def _sum_all(v):
    # Full reduction of a 2-D tile to (1, 1) (lane axis first).
    return jnp.sum(jnp.sum(v, axis=1, keepdims=True), axis=0, keepdims=True)


# ------------------------------ fused kernel -------------------------------

def _net_fused_kernel(
    # data (per batch tile)
    x_ref, e_ref, s_idx_ref, eps_ref,
    # fused weights / biases (broadcast)
    w1_ref, b1_ref, w2_ref, b2_ref, wd1_ref, bd1_ref, wd2_ref, bd2_ref,
    # outputs
    loss_ref, c_ref,
    *, n, tile_n, dim_z, dim_c, dim_s, tech_ib_coef, s_coef, mod_coef,
):
    f32 = jnp.float32
    dz = dim_z

    x = x_ref[...]                               # (tile_n, DH)  [rna | adt]
    e = e_ref[...]
    h = jnp.log1p(x) * e                         # preprocess: log1p then mask
    dh_total = x.shape[1]

    # valid-row mask for the padded tail of the last block
    row0 = pl.program_id(0) * tile_n
    rows = row0 + jax.lax.broadcasted_iota(jnp.int32, (tile_n, 1), 0)
    valid = (rows < n).astype(f32)               # (tile_n, 1)

    # one-hot(s); padded rows masked to all-zero (-> zero CE contribution)
    lanes = jax.lax.broadcasted_iota(jnp.int32, (tile_n, dim_s), 1)
    s_onehot = (lanes == s_idx_ref[...]).astype(f32) * valid

    # ---- fused encoder layer 1 (block-diag rna | adt | s-enc) + Mish ----
    in1 = jnp.concatenate([h, s_onehot], axis=1)                       # (tile_n, DH+dim_s)
    h1 = _mish(jnp.dot(in1, w1_ref[...], preferred_element_type=f32) + b1_ref[...])

    # ---- fused encoder layer 2; columns pre-permuted to [mu_all | lv_all] ----
    zz = jnp.dot(h1, w2_ref[...], preferred_element_type=f32) + b2_ref[...]
    mu_all = zz[:, :3 * dz]                      # [mu_rna | mu_adt | mu_s]
    lv_all = zz[:, 3 * dz:]                      # [lv_rna | lv_adt | lv_s]

    # ---- product of experts; prior expert (mu=0, logvar=0) folded ----
    prior_T = 1.0 / (1.0 + _EPS)
    T_all = _custom_exp(-lv_all)                 # (tile_n, 3*dz)
    muT = mu_all * T_all
    T_rna, T_adt, T_s = T_all[:, :dz], T_all[:, dz:2 * dz], T_all[:, 2 * dz:]
    muT_rna, muT_adt, muT_s = muT[:, :dz], muT[:, dz:2 * dz], muT[:, 2 * dz:]

    base_T = prior_T + T_s
    Ts_rna = base_T + T_rna
    Ts_adt = base_T + T_adt
    Ts_j = Ts_rna + T_adt
    num_rna = muT_rna + muT_s
    num_adt = muT_adt + muT_s
    num_j = num_rna + muT_adt

    # lane-pack the three posteriors: [joint | uni_rna | uni_adt]
    T_sum_all = jnp.concatenate([Ts_j, Ts_rna, Ts_adt], axis=1)        # (tile_n, 3*dz)
    num_all = jnp.concatenate([num_j, num_rna, num_adt], axis=1)
    inv_all = 1.0 / T_sum_all
    mu_out = num_all * inv_all                   # [z_mu | uni_mu_rna | uni_mu_adt]
    var_all = inv_all + _EPS                     # = exp(logvar) of each posterior

    z_mu = mu_out[:, :dz]
    z_var = var_all[:, :dz]
    z_logvar = jnp.log(z_var)
    z = z_mu                                     # eval mode: z = z_mu

    # unimodal sampling: mu + exp(logvar/2)*eps = mu + sqrt(var)*eps
    uni_mu = mu_out[:, dz:]                      # (tile_n, 2*dz) [rna | adt]
    uni_std = jnp.sqrt(var_all[:, dz:])
    z_uni = uni_mu + uni_std * eps_ref[...]

    # ---- fused decoders (x_dec | s_dec block-diag; b = z[:, dim_c:]) ----
    hd = _mish(jnp.dot(z, wd1_ref[...], preferred_element_type=f32) + bd1_ref[...])
    dec2 = jnp.dot(hd, wd2_ref[...], preferred_element_type=f32) + bd2_ref[...]
    x_r = dec2[:, :dh_total]                     # concatenated x_r_pre
    s_r = dec2[:, dh_total:]                     # s_r_pre (tile_n, dim_s)

    # ---- LossCalculator (per-block partial sums) ----
    inv_n = 1.0 / float(n)

    # PoissonNLLLoss(log_input=True, full=True) * e, masked against padded rows.
    em = e * valid
    pois = jnp.exp(x_r) - x * x_r
    x_safe = jnp.where(x > 1.0, x, 2.0)
    lg = jnp.log(x_safe)
    stirling = x_safe * lg - x_safe + 0.5 * (_LOG_2PI + lg)
    pois = pois + jnp.where(x > 1.0, stirling, 0.0)
    pois_sum = _sum_all(pois * em)

    # CrossEntropy(s_r_pre, s).sum() with (already masked) one-hot targets.
    mmax = jnp.max(s_r, axis=1, keepdims=True)
    lse = mmax + jnp.log(jnp.sum(jnp.exp(s_r - mmax), axis=1, keepdims=True))
    ce_sum = _sum_all(-s_onehot * (s_r - lse))

    loss_recon = (pois_sum + ce_sum * (tech_ib_coef + s_coef)) * inv_n

    # KLD of the joint posterior; c/b split folded into one lane-weighted sum.
    kld = -0.5 * (1.0 + z_logvar - z_mu * z_mu - z_var)
    lane_idx = jax.lax.broadcasted_iota(jnp.int32, (1, dz), 1)
    kld_w = jnp.where(lane_idx < dim_c, 1.0, 1.0 + tech_ib_coef)
    loss_kld_z = _sum_all(kld * kld_w * valid) * inv_n

    # Modality alignment; exact 2-modality identity: 0.5*sum((a-b)^2)/N.
    d = z_uni[:, :dz] - z_uni[:, dz:]
    loss_mod = 0.5 * _sum_all(d * d * valid) * inv_n * mod_coef

    total = loss_recon + loss_kld_z + loss_mod                         # (1, 1)
    loss_ref[...] = jnp.reshape(total, (1, 1, 1))

    # lane-dense merged output: [z_mu | z_uni_rna | z_uni_adt]; sliced outside.
    c_ref[...] = jnp.concatenate([z_mu, z_uni], axis=1)


# ------------------------------ parameters ---------------------------------

def init_linear(key, d_in, d_out):
    kw, kb = jax.random.split(key)
    w = jax.random.normal(kw, (d_in, d_out), jnp.float32) / jnp.sqrt(float(d_in))
    b = jax.random.normal(kb, (d_out,), jnp.float32) * 0.01
    return w, b


def init_params(key, o):
    keys = iter(jax.random.split(key, 16))
    dim_z2 = 2 * o["dim_z"]
    p = {}
    p["x_indiv"] = {m: init_linear(next(keys), o["dims_h"][m], o["dims_enc_x"][0])
                    for m in o["ref_mods"]}
    p["x_shared"] = init_linear(next(keys), o["dims_enc_x"][0], dim_z2)
    p["x_dec"] = [init_linear(next(keys), o["dim_z"], o["dims_dec_x"][0]),
                  init_linear(next(keys), o["dims_dec_x"][0], sum(o["dims_h"].values()))]
    p["s_enc"] = [init_linear(next(keys), o["dim_s"], o["dims_enc_s"][0]),
                  init_linear(next(keys), o["dims_enc_s"][0], dim_z2)]
    p["s_dec"] = [init_linear(next(keys), o["dim_b"], o["dims_dec_s"][0]),
                  init_linear(next(keys), o["dims_dec_s"][0], o["dim_s"])]
    return p


def _pack_weights(params, o):
    """Assemble the 4 block-diagonal fused weight matrices + packed biases."""
    dz, dc = o["dim_z"], o["dim_c"]
    w_rna, b_rna = params["x_indiv"]["rna"]
    w_adt, b_adt = params["x_indiv"]["adt"]
    w_se1, b_se1 = params["s_enc"][0]
    w_sh, b_sh = params["x_shared"]
    w_se2, b_se2 = params["s_enc"][1]
    w_xd1, b_xd1 = params["x_dec"][0]
    w_xd2, b_xd2 = params["x_dec"][1]
    w_sd1, b_sd1 = params["s_dec"][0]
    w_sd2, b_sd2 = params["s_dec"][1]

    # encoder layer 1: block-diag over [rna | adt | s-enc-1]
    w1 = block_diag(w_rna, w_adt, w_se1)
    b1 = jnp.concatenate([b_rna, b_adt, b_se1]).reshape(1, -1)

    # encoder layer 2: block-diag [shared | shared | s-enc-2], columns permuted
    # so the kernel sees [mu_rna|mu_adt|mu_s | lv_rna|lv_adt|lv_s].
    w2_bd = block_diag(w_sh, w_sh, w_se2)
    b2_bd = jnp.concatenate([b_sh, b_sh, b_se2])
    mu_cols = jnp.concatenate([jnp.arange(k * 2 * dz, k * 2 * dz + dz) for k in range(3)])
    perm = jnp.concatenate([mu_cols, mu_cols + dz])
    w2 = w2_bd[:, perm]
    b2 = b2_bd[perm].reshape(1, -1)

    # decoder layer 1: z @ [w_xdec1 | [0; w_sdec1]]  (b = z[:, dim_c:])
    w_sd1_pad = jnp.concatenate(
        [jnp.zeros((dc, w_sd1.shape[1]), jnp.float32), w_sd1], axis=0)
    wd1 = jnp.concatenate([w_xd1, w_sd1_pad], axis=1)
    bd1 = jnp.concatenate([b_xd1, b_sd1]).reshape(1, -1)

    # decoder layer 2: block-diag [x_dec-2 | s_dec-2]
    wd2 = block_diag(w_xd2, w_sd2)
    bd2 = jnp.concatenate([b_xd2, b_sd2]).reshape(1, -1)
    return w1, b1, w2, b2, wd1, bd1, wd2, bd2


# ------------------------------- forward -----------------------------------

def _round_up(a, b):
    return ((a + b - 1) // b) * b


def net_forward(params, inputs, o, sample_key, tile_n=1024):
    """Eval-mode forward of Net, fused in one batch-tiled Pallas call."""
    dz, dc, ds = o["dim_z"], o["dim_c"], o["dim_s"]
    mods = o["ref_mods"]
    n = inputs["s"]["joint"].shape[0]

    # Gaussian noise for z_uni sampling (jax.random stream preserved).
    skeys = jax.random.split(sample_key, len(mods))
    eps_cat = jnp.concatenate(
        [jax.random.normal(skeys[i], (n, dz), jnp.float32) for i in range(len(mods))],
        axis=1)
    # TODO(synk): torch RNG (s-dropout coin flip, sample_gaussian) is replaced by JAX PRNG.

    # wrapper-side lane-dense input packing
    x_cat = jnp.concatenate([inputs["x"][m] for m in mods], axis=1).astype(jnp.float32)
    e_cat = jnp.concatenate([inputs["e"][m] for m in mods], axis=1).astype(jnp.float32)
    s_idx = inputs["s"]["joint"].astype(jnp.int32)
    dh_total = x_cat.shape[1]

    # batch tiling (TILE_N multiple of 8; pad rows are masked inside the kernel)
    tile = min(tile_n, _round_up(n, 8))
    n_pad = _round_up(n, tile)
    grid = n_pad // tile
    if n_pad != n:
        pad = n_pad - n
        x_cat = jnp.pad(x_cat, ((0, pad), (0, 0)))
        e_cat = jnp.pad(e_cat, ((0, pad), (0, 0)))
        eps_cat = jnp.pad(eps_cat, ((0, pad), (0, 0)))
        s_idx = jnp.pad(s_idx, ((0, pad), (0, 0)), constant_values=-1)

    w1, b1, w2, b2, wd1, bd1, wd2, bd2 = _pack_weights(params, o)
    weight_args = (w1, b1, w2, b2, wd1, bd1, wd2, bd2)

    kernel = functools.partial(
        _net_fused_kernel,
        n=n, tile_n=tile, dim_z=dz, dim_c=dc, dim_s=ds,
        tech_ib_coef=4.0, s_coef=1000.0, mod_coef=50.0)

    data_specs = [
        pl.BlockSpec((tile, dh_total), lambda i: (i, 0)),   # x
        pl.BlockSpec((tile, dh_total), lambda i: (i, 0)),   # e
        pl.BlockSpec((tile, 1), lambda i: (i, 0)),          # s index
        pl.BlockSpec((tile, 2 * dz), lambda i: (i, 0)),     # eps [rna | adt]
    ]
    weight_specs = [pl.BlockSpec(a.shape, lambda i: (0, 0)) for a in weight_args]

    loss_parts, c_buf = pl.pallas_call(
        kernel,
        grid=(grid,),
        out_shape=(jax.ShapeDtypeStruct((grid, 1, 1), jnp.float32),
                   jax.ShapeDtypeStruct((n_pad, 3 * dz), jnp.float32)),
        in_specs=data_specs + weight_specs,
        out_specs=(pl.BlockSpec((1, 1, 1), lambda i: (i, 0, 0)),
                   pl.BlockSpec((tile, 3 * dz), lambda i: (i, 0))),
        compiler_params=pltpu.CompilerParams(
            dimension_semantics=("parallel",)),
    )(x_cat, e_cat, s_idx, eps_cat, *weight_args)

    loss = jnp.sum(loss_parts)
    c_all = {
        "joint": c_buf[:n, :dc],
        mods[0]: c_buf[:n, dz:dz + dc],
        mods[1]: c_buf[:n, 2 * dz:2 * dz + dc],
    }
    return loss, c_all


# -------------------------------- driver -----------------------------------

if __name__ == "__main__":
    o = dict(
        ref_mods=["rna", "adt"],
        dims_x={"rna": 32, "adt": 16},
        dims_h={"rna": 32, "adt": 16},
        dims_enc_x=[32],
        dims_dec_x=[32],
        dim_z=16, dim_c=10, dim_b=6,
        dim_s=3, dims_enc_s=[16], dims_dec_s=[16],
    )
    N = 8

    key = jax.random.PRNGKey(0)
    kp, k1, k2, k3, k4, k5, ks = jax.random.split(key, 7)

    params = init_params(kp, o)

    inputs = {
        "x": {
            "rna": jax.random.randint(k1, (N, o["dims_x"]["rna"]), 0, 6).astype(jnp.float32),
            "adt": jax.random.randint(k2, (N, o["dims_x"]["adt"]), 0, 6).astype(jnp.float32),
        },
        "e": {
            "rna": (jax.random.uniform(k3, (N, o["dims_x"]["rna"])) > 0.1).astype(jnp.float32),
            "adt": (jax.random.uniform(k4, (N, o["dims_x"]["adt"])) > 0.1).astype(jnp.float32),
        },
        "s": {"joint": jax.random.randint(k5, (N, 1), 0, o["dim_s"])},
    }

    # TODO(synk): BatchNorm/Dropout (o.norm / o.drop) are disabled in this config.
    loss, c_all = net_forward(params, inputs, o, ks)
    loss = jax.block_until_ready(loss)
    for v in c_all.values():
        jax.block_until_ready(v)

    assert jnp.isfinite(loss), "loss is not finite"
    print("KERNEL_OK")
</pallas_src>

<mosaic_0001>
module attributes {stable_mosaic.version = 11 : i64} {
  func.func @_net_fused_kernel(%arg0: i32, %arg1: memref<8x48xf32, #tpu.memory_space<vmem>>, %arg2: memref<8x48xf32, #tpu.memory_space<vmem>>, %arg3: memref<8x1xi32, #tpu.memory_space<vmem>>, %arg4: memref<8x32xf32, #tpu.memory_space<vmem>>, %arg5: memref<51x80xf32, #tpu.memory_space<vmem>>, %arg6: memref<1x80xf32, #tpu.memory_space<vmem>>, %arg7: memref<80x96xf32, #tpu.memory_space<vmem>>, %arg8: memref<1x96xf32, #tpu.memory_space<vmem>>, %arg9: memref<16x48xf32, #tpu.memory_space<vmem>>, %arg10: memref<1x48xf32, #tpu.memory_space<vmem>>, %arg11: memref<48x51xf32, #tpu.memory_space<vmem>>, %arg12: memref<1x51xf32, #tpu.memory_space<vmem>>, %arg13: memref<1x1x1xf32, #tpu.memory_space<vmem>>, %arg14: memref<8x48xf32, #tpu.memory_space<vmem>>) attributes {dimension_semantics = [#tpu.dimension_semantics<parallel>], iteration_bounds = array<i64: 1>, scalar_prefetch = 0 : i64, scratch_operands = 0 : i64, tpu.core_type = #tpu.core_type<tc>, window_params = [{transform_indices = @transform_0, window_bounds = array<i64: 8, 48>}, {transform_indices = @transform_1, window_bounds = array<i64: 8, 48>}, {transform_indices = @transform_2, window_bounds = array<i64: 8, 1>}, {transform_indices = @transform_3, window_bounds = array<i64: 8, 32>}, {pipeline_mode = #tpu.pipeline_mode<synchronous>, transform_indices = @transform_4, window_bounds = array<i64: 51, 80>}, {pipeline_mode = #tpu.pipeline_mode<synchronous>, transform_indices = @transform_5, window_bounds = array<i64: 1, 80>}, {pipeline_mode = #tpu.pipeline_mode<synchronous>, transform_indices = @transform_6, window_bounds = array<i64: 80, 96>}, {pipeline_mode = #tpu.pipeline_mode<synchronous>, transform_indices = @transform_7, window_bounds = array<i64: 1, 96>}, {pipeline_mode = #tpu.pipeline_mode<synchronous>, transform_indices = @transform_8, window_bounds = array<i64: 16, 48>}, {pipeline_mode = #tpu.pipeline_mode<synchronous>, transform_indices = @transform_9, window_bounds = array<i64: 1, 48>}, {pipeline_mode = #tpu.pipeline_mode<synchronous>, transform_indices = @transform_10, window_bounds = array<i64: 48, 51>}, {pipeline_mode = #tpu.pipeline_mode<synchronous>, transform_indices = @transform_11, window_bounds = array<i64: 1, 51>}, {transform_indices = @transform_12, window_bounds = array<i64: 1, 1, 1>}, {transform_indices = @transform_13, window_bounds = array<i64: 8, 48>}]} {
    %c0 = arith.constant 0 : index
    %c0_0 = arith.constant 0 : index
    %0 = vector.load %arg1[%c0, %c0_0] : memref<8x48xf32, #tpu.memory_space<vmem>>, vector<8x48xf32>
    %c0_1 = arith.constant 0 : index
    %c0_2 = arith.constant 0 : index
    %1 = vector.load %arg2[%c0_1, %c0_2] : memref<8x48xf32, #tpu.memory_space<vmem>>, vector<8x48xf32>
    %2 = math.log1p %0 : vector<8x48xf32>
    %3 = arith.mulf %2, %1 : vector<8x48xf32>
    %c8_i32 = arith.constant 8 : i32
    %4 = arith.muli %arg0, %c8_i32 : i32
    %5 = tpu.iota {dimensions = array<i32: 0>} : vector<8x1xi32>
    %6 = vector.broadcast %4 : i32 to vector<8x1xi32>
    %7 = arith.addi %6, %5 : vector<8x1xi32>
    %c8_i32_3 = arith.constant 8 : i32
    %8 = vector.broadcast %c8_i32_3 : i32 to vector<8x1xi32>
    %9 = arith.cmpi slt, %7, %8 : vector<8x1xi32>
    %10 = arith.extui %9 : vector<8x1xi1> to vector<8x1xi32>
    %11 = arith.sitofp %10 : vector<8x1xi32> to vector<8x1xf32>
    %12 = tpu.iota {dimensions = array<i32: 1>} : vector<8x3xi32>
    %c0_4 = arith.constant 0 : index
    %c0_5 = arith.constant 0 : index
    %13 = vector.load %arg3[%c0_4, %c0_5] : memref<8x1xi32, #tpu.memory_space<vmem>>, vector<8x1xi32>
    %14 = vector.broadcast %13 : vector<8x1xi32> to vector<8x3xi32>
    %15 = arith.cmpi eq, %12, %14 : vector<8x3xi32>
    %16 = arith.extui %15 : vector<8x3xi1> to vector<8x3xi32>
    %17 = arith.sitofp %16 : vector<8x3xi32> to vector<8x3xf32>
    %18 = vector.broadcast %11 : vector<8x1xf32> to vector<8x3xf32>
    %19 = arith.mulf %17, %18 : vector<8x3xf32>
    %20 = tpu.concatenate %3, %19 in 1 : vector<8x48xf32>, vector<8x3xf32> -> vector<8x51xf32>
    %c0_6 = arith.constant 0 : index
    %c0_7 = arith.constant 0 : index
    %21 = vector.load %arg5[%c0_6, %c0_7] : memref<51x80xf32, #tpu.memory_space<vmem>>, vector<51x80xf32>
    %cst = arith.constant dense<0.000000e+00> : vector<8x80xf32>
    %22 = tpu.matmul %20, %21, %cst {dimension_numbers = #tpu.dot_dimension_numbers<[1], [0], [0], [1], [0, 0, 1, 1], [], []>} : vector<8x51xf32>, vector<51x80xf32>, vector<8x80xf32> -> vector<8x80xf32>
    %c0_8 = arith.constant 0 : index
    %c0_9 = arith.constant 0 : index
    %23 = vector.load %arg6[%c0_8, %c0_9] : memref<1x80xf32, #tpu.memory_space<vmem>>, vector<1x80xf32>
    %24 = vector.broadcast %23 : vector<1x80xf32> to vector<8x80xf32>
    %25 = arith.addf %22, %24 : vector<8x80xf32>
    %cst_10 = arith.constant 2.000000e+01 : f32
    %26 = vector.broadcast %cst_10 : f32 to vector<8x80xf32>
    %27 = arith.minimumf %25, %26 : vector<8x80xf32>
    %28 = math.exp %27 : vector<8x80xf32>
    %cst_11 = arith.constant 2.000000e+00 : f32
    %29 = vector.broadcast %cst_11 : f32 to vector<8x80xf32>
    %30 = arith.addf %28, %29 : vector<8x80xf32>
    %31 = arith.mulf %28, %30 : vector<8x80xf32>
    %cst_12 = arith.constant 2.000000e+00 : f32
    %32 = vector.broadcast %cst_12 : f32 to vector<8x80xf32>
    %33 = arith.addf %31, %32 : vector<8x80xf32>
    %34 = arith.divf %31, %33 : vector<8x80xf32>
    %35 = arith.mulf %25, %34 : vector<8x80xf32>
    %c0_13 = arith.constant 0 : index
    %c0_14 = arith.constant 0 : index
    %36 = vector.load %arg7[%c0_13, %c0_14] : memref<80x96xf32, #tpu.memory_space<vmem>>, vector<80x96xf32>
    %cst_15 = arith.constant dense<0.000000e+00> : vector<8x96xf32>
    %37 = tpu.matmul %35, %36, %cst_15 {dimension_numbers = #tpu.dot_dimension_numbers<[1], [0], [0], [1], [0, 0, 1, 1], [], []>} : vector<8x80xf32>, vector<80x96xf32>, vector<8x96xf32> -> vector<8x96xf32>
    %c0_16 = arith.constant 0 : index
    %c0_17 = arith.constant 0 : index
    %38 = vector.load %arg8[%c0_16, %c0_17] : memref<1x96xf32, #tpu.memory_space<vmem>>, vector<1x96xf32>
    %39 = vector.broadcast %38 : vector<1x96xf32> to vector<8x96xf32>
    %40 = arith.addf %37, %39 : vector<8x96xf32>
    %41 = vector.extract_strided_slice %40 {offsets = [0, 0], sizes = [8, 48], strides = [1, 1]} : vector<8x96xf32> to vector<8x48xf32>
    %42 = vector.extract_strided_slice %40 {offsets = [0, 48], sizes = [8, 48], strides = [1, 1]} : vector<8x96xf32> to vector<8x48xf32>
    %cst_18 = arith.constant 0.000000e+00 : f32
    %43 = vector.broadcast %cst_18 : f32 to vector<8x48xf32>
    %44 = arith.subf %43, %42 : vector<8x48xf32>
    %45 = math.absf %44 : vector<8x48xf32>
    %cst_19 = arith.constant 0.000000e+00 : f32
    %46 = vector.broadcast %cst_19 : f32 to vector<8x48xf32>
    %47 = arith.subf %46, %45 : vector<8x48xf32>
    %48 = math.exp %47 : vector<8x48xf32>
    %cst_20 = arith.constant 0.000000e+00 : f32
    %49 = vector.broadcast %cst_20 : f32 to vector<8x48xf32>
    %50 = arith.cmpf olt, %44, %49 : vector<8x48xf32>
    %cst_21 = arith.constant 9.99999996E-13 : f32
    %51 = vector.broadcast %cst_21 : f32 to vector<8x48xf32>
    %52 = arith.addf %48, %51 : vector<8x48xf32>
    %cst_22 = arith.constant 1.000000e+00 : f32
    %53 = vector.broadcast %cst_22 : f32 to vector<8x48xf32>
    %54 = arith.divf %53, %52 : vector<8x48xf32>
    %55 = arith.select %50, %48, %54 : vector<8x48xi1>, vector<8x48xf32>
    %56 = arith.mulf %41, %55 : vector<8x48xf32>
    %57 = vector.extract_strided_slice %55 {offsets = [0, 0], sizes = [8, 16], strides = [1, 1]} : vector<8x48xf32> to vector<8x16xf32>
    %58 = vector.extract_strided_slice %55 {offsets = [0, 16], sizes = [8, 16], strides = [1, 1]} : vector<8x48xf32> to vector<8x16xf32>
    %59 = vector.extract_strided_slice %55 {offsets = [0, 32], sizes = [8, 16], strides = [1, 1]} : vector<8x48xf32> to vector<8x16xf32>
    %60 = vector.extract_strided_slice %56 {offsets = [0, 0], sizes = [8, 16], strides = [1, 1]} : vector<8x48xf32> to vector<8x16xf32>
    %61 = vector.extract_strided_slice %56 {offsets = [0, 16], sizes = [8, 16], strides = [1, 1]} : vector<8x48xf32> to vector<8x16xf32>
    %62 = vector.extract_strided_slice %56 {offsets = [0, 32], sizes = [8, 16], strides = [1, 1]} : vector<8x48xf32> to vector<8x16xf32>
    %cst_23 = arith.constant 1.000000e+00 : f32
    %63 = vector.broadcast %cst_23 : f32 to vector<8x16xf32>
    %64 = arith.addf %63, %59 : vector<8x16xf32>
    %65 = arith.addf %64, %57 : vector<8x16xf32>
    %66 = arith.addf %64, %58 : vector<8x16xf32>
    %67 = arith.addf %65, %58 : vector<8x16xf32>
    %68 = arith.addf %60, %62 : vector<8x16xf32>
    %69 = arith.addf %61, %62 : vector<8x16xf32>
    %70 = arith.addf %68, %61 : vector<8x16xf32>
    %71 = tpu.concatenate %67, %65, %66 in 1 : vector<8x16xf32>, vector<8x16xf32>, vector<8x16xf32> -> vector<8x48xf32>
    %72 = tpu.concatenate %70, %68, %69 in 1 : vector<8x16xf32>, vector<8x16xf32>, vector<8x16xf32> -> vector<8x48xf32>
    %cst_24 = arith.constant 1.000000e+00 : f32
    %73 = vector.broadcast %cst_24 : f32 to vector<8x48xf32>
    %74 = arith.divf %73, %71 : vector<8x48xf32>
    %75 = arith.mulf %72, %74 : vector<8x48xf32>
    %cst_25 = arith.constant 9.99999996E-13 : f32
    %76 = vector.broadcast %cst_25 : f32 to vector<8x48xf32>
    %77 = arith.addf %74, %76 : vector<8x48xf32>
    %78 = vector.extract_strided_slice %75 {offsets = [0, 0], sizes = [8, 16], strides = [1, 1]} : vector<8x48xf32> to vector<8x16xf32>
    %79 = vector.extract_strided_slice %77 {offsets = [0, 0], sizes = [8, 16], strides = [1, 1]} : vector<8x48xf32> to vector<8x16xf32>
    %80 = math.log %79 : vector<8x16xf32>
    %81 = vector.extract_strided_slice %75 {offsets = [0, 16], sizes = [8, 32], strides = [1, 1]} : vector<8x48xf32> to vector<8x32xf32>
    %82 = vector.extract_strided_slice %77 {offsets = [0, 16], sizes = [8, 32], strides = [1, 1]} : vector<8x48xf32> to vector<8x32xf32>
    %83 = math.sqrt %82 : vector<8x32xf32>
    %c0_26 = arith.constant 0 : index
    %c0_27 = arith.constant 0 : index
    %84 = vector.load %arg4[%c0_26, %c0_27] : memref<8x32xf32, #tpu.memory_space<vmem>>, vector<8x32xf32>
    %85 = arith.mulf %83, %84 : vector<8x32xf32>
    %86 = arith.addf %81, %85 : vector<8x32xf32>
    %c0_28 = arith.constant 0 : index
    %c0_29 = arith.constant 0 : index
    %87 = vector.load %arg9[%c0_28, %c0_29] : memref<16x48xf32, #tpu.memory_space<vmem>>, vector<16x48xf32>
    %cst_30 = arith.constant dense<0.000000e+00> : vector<8x48xf32>
    %88 = tpu.matmul %78, %87, %cst_30 {dimension_numbers = #tpu.dot_dimension_numbers<[1], [0], [0], [1], [0, 0, 1, 1], [], []>} : vector<8x16xf32>, vector<16x48xf32>, vector<8x48xf32> -> vector<8x48xf32>
    %c0_31 = arith.constant 0 : index
    %c0_32 = arith.constant 0 : index
    %89 = vector.load %arg10[%c0_31, %c0_32] : memref<1x48xf32, #tpu.memory_space<vmem>>, vector<1x48xf32>
    %90 = vector.broadcast %89 : vector<1x48xf32> to vector<8x48xf32>
    %91 = arith.addf %88, %90 : vector<8x48xf32>
    %cst_33 = arith.constant 2.000000e+01 : f32
    %92 = vector.broadcast %cst_33 : f32 to vector<8x48xf32>
    %93 = arith.minimumf %91, %92 : vector<8x48xf32>
    %94 = math.exp %93 : vector<8x48xf32>
    %cst_34 = arith.constant 2.000000e+00 : f32
    %95 = vector.broadcast %cst_34 : f32 to vector<8x48xf32>
    %96 = arith.addf %94, %95 : vector<8x48xf32>
    %97 = arith.mulf %94, %96 : vector<8x48xf32>
    %cst_35 = arith.constant 2.000000e+00 : f32
    %98 = vector.broadcast %cst_35 : f32 to vector<8x48xf32>
    %99 = arith.addf %97, %98 : vector<8x48xf32>
    %100 = arith.divf %97, %99 : vector<8x48xf32>
    %101 = arith.mulf %91, %100 : vector<8x48xf32>
    %c0_36 = arith.constant 0 : index
    %c0_37 = arith.constant 0 : index
    %102 = vector.load %arg11[%c0_36, %c0_37] : memref<48x51xf32, #tpu.memory_space<vmem>>, vector<48x51xf32>
    %cst_38 = arith.constant dense<0.000000e+00> : vector<8x51xf32>
    %103 = tpu.matmul %101, %102, %cst_38 {dimension_numbers = #tpu.dot_dimension_numbers<[1], [0], [0], [1], [0, 0, 1, 1], [], []>} : vector<8x48xf32>, vector<48x51xf32>, vector<8x51xf32> -> vector<8x51xf32>
    %c0_39 = arith.constant 0 : index
    %c0_40 = arith.constant 0 : index
    %104 = vector.load %arg12[%c0_39, %c0_40] : memref<1x51xf32, #tpu.memory_space<vmem>>, vector<1x51xf32>
    %105 = vector.broadcast %104 : vector<1x51xf32> to vector<8x51xf32>
    %106 = arith.addf %103, %105 : vector<8x51xf32>
    %107 = vector.extract_strided_slice %106 {offsets = [0, 0], sizes = [8, 48], strides = [1, 1]} : vector<8x51xf32> to vector<8x48xf32>
    %108 = vector.extract_strided_slice %106 {offsets = [0, 48], sizes = [8, 3], strides = [1, 1]} : vector<8x51xf32> to vector<8x3xf32>
    %109 = vector.broadcast %11 : vector<8x1xf32> to vector<8x48xf32>
    %110 = arith.mulf %1, %109 : vector<8x48xf32>
    %111 = math.exp %107 : vector<8x48xf32>
    %112 = arith.mulf %0, %107 : vector<8x48xf32>
    %113 = arith.subf %111, %112 : vector<8x48xf32>
    %cst_41 = arith.constant 1.000000e+00 : f32
    %114 = vector.broadcast %cst_41 : f32 to vector<8x48xf32>
    %115 = arith.cmpf ogt, %0, %114 : vector<8x48xf32>
    %cst_42 = arith.constant 2.000000e+00 : f32
    %116 = vector.broadcast %cst_42 : f32 to vector<8x48xf32>
    %117 = arith.select %115, %0, %116 : vector<8x48xi1>, vector<8x48xf32>
    %118 = math.log %117 : vector<8x48xf32>
    %119 = arith.mulf %117, %118 : vector<8x48xf32>
    %120 = arith.subf %119, %117 : vector<8x48xf32>
    %cst_43 = arith.constant 1.83787704 : f32
    %121 = vector.broadcast %cst_43 : f32 to vector<8x48xf32>
    %122 = arith.addf %121, %118 : vector<8x48xf32>
    %cst_44 = arith.constant 5.000000e-01 : f32
    %123 = vector.broadcast %cst_44 : f32 to vector<8x48xf32>
    %124 = arith.mulf %123, %122 : vector<8x48xf32>
    %125 = arith.addf %120, %124 : vector<8x48xf32>
    %cst_45 = arith.constant 1.000000e+00 : f32
    %126 = vector.broadcast %cst_45 : f32 to vector<8x48xf32>
    %127 = arith.cmpf ogt, %0, %126 : vector<8x48xf32>
    %cst_46 = arith.constant 0.000000e+00 : f32
    %128 = vector.broadcast %cst_46 : f32 to vector<8x48xf32>
    %129 = arith.select %127, %125, %128 : vector<8x48xi1>, vector<8x48xf32>
    %130 = arith.addf %113, %129 : vector<8x48xf32>
    %131 = arith.mulf %130, %110 : vector<8x48xf32>
    %cst_47 = arith.constant dense<0.000000e+00> : vector<8xf32>
    %132 = vector.multi_reduction <add>, %131, %cst_47 [1] : vector<8x48xf32> to vector<8xf32>
    %133 = vector.shape_cast %132 : vector<8xf32> to vector<8x1xf32>
    %cst_48 = arith.constant dense<0.000000e+00> : vector<1xf32>
    %134 = vector.multi_reduction <add>, %133, %cst_48 [0] : vector<8x1xf32> to vector<1xf32>
    %135 = vector.shape_cast %134 : vector<1xf32> to vector<1x1xf32>
    %cst_49 = arith.constant dense<0xFF800000> : vector<8xf32>
    %136 = vector.multi_reduction <maximumf>, %108, %cst_49 [1] : vector<8x3xf32> to vector<8xf32>
    %137 = vector.shape_cast %136 : vector<8xf32> to vector<8x1xf32>
    %138 = vector.broadcast %137 : vector<8x1xf32> to vector<8x3xf32>
    %139 = arith.subf %108, %138 : vector<8x3xf32>
    %140 = math.exp %139 : vector<8x3xf32>
    %cst_50 = arith.constant dense<0.000000e+00> : vector<8xf32>
    %141 = vector.multi_reduction <add>, %140, %cst_50 [1] : vector<8x3xf32> to vector<8xf32>
    %142 = vector.shape_cast %141 : vector<8xf32> to vector<8x1xf32>
    %143 = math.log %142 : vector<8x1xf32>
    %144 = arith.addf %137, %143 : vector<8x1xf32>
    %cst_51 = arith.constant 0.000000e+00 : f32
    %145 = vector.broadcast %cst_51 : f32 to vector<8x3xf32>
    %146 = arith.subf %145, %19 : vector<8x3xf32>
    %147 = vector.broadcast %144 : vector<8x1xf32> to vector<8x3xf32>
    %148 = arith.subf %108, %147 : vector<8x3xf32>
    %149 = arith.mulf %146, %148 : vector<8x3xf32>
    %cst_52 = arith.constant dense<0.000000e+00> : vector<8xf32>
    %150 = vector.multi_reduction <add>, %149, %cst_52 [1] : vector<8x3xf32> to vector<8xf32>
    %151 = vector.shape_cast %150 : vector<8xf32> to vector<8x1xf32>
    %cst_53 = arith.constant dense<0.000000e+00> : vector<1xf32>
    %152 = vector.multi_reduction <add>, %151, %cst_53 [0] : vector<8x1xf32> to vector<1xf32>
    %153 = vector.shape_cast %152 : vector<1xf32> to vector<1x1xf32>
    %cst_54 = arith.constant 1.004000e+03 : f32
    %154 = vector.broadcast %cst_54 : f32 to vector<1x1xf32>
    %155 = arith.mulf %153, %154 : vector<1x1xf32>
    %156 = arith.addf %135, %155 : vector<1x1xf32>
    %cst_55 = arith.constant 1.250000e-01 : f32
    %157 = vector.broadcast %cst_55 : f32 to vector<1x1xf32>
    %158 = arith.mulf %156, %157 : vector<1x1xf32>
    %cst_56 = arith.constant 1.000000e+00 : f32
    %159 = vector.broadcast %cst_56 : f32 to vector<8x16xf32>
    %160 = arith.addf %159, %80 : vector<8x16xf32>
    %161 = arith.mulf %78, %78 : vector<8x16xf32>
    %162 = arith.subf %160, %161 : vector<8x16xf32>
    %163 = arith.subf %162, %79 : vector<8x16xf32>
    %cst_57 = arith.constant -5.000000e-01 : f32
    %164 = vector.broadcast %cst_57 : f32 to vector<8x16xf32>
    %165 = arith.mulf %164, %163 : vector<8x16xf32>
    %166 = tpu.iota {dimensions = array<i32: 1>} : vector<1x16xi32>
    %c10_i32 = arith.constant 10 : i32
    %167 = vector.broadcast %c10_i32 : i32 to vector<1x16xi32>
    %168 = arith.cmpi slt, %166, %167 : vector<1x16xi32>
    %cst_58 = arith.constant 1.000000e+00 : f32
    %cst_59 = arith.constant 5.000000e+00 : f32
    %169 = vector.broadcast %cst_58 : f32 to vector<1x16xf32>
    %170 = vector.broadcast %cst_59 : f32 to vector<1x16xf32>
    %171 = arith.select %168, %169, %170 : vector<1x16xi1>, vector<1x16xf32>
    %172 = vector.broadcast %171 : vector<1x16xf32> to vector<8x16xf32>
    %173 = arith.mulf %165, %172 : vector<8x16xf32>
    %174 = vector.broadcast %11 : vector<8x1xf32> to vector<8x16xf32>
    %175 = arith.mulf %173, %174 : vector<8x16xf32>
    %cst_60 = arith.constant dense<0.000000e+00> : vector<8xf32>
    %176 = vector.multi_reduction <add>, %175, %cst_60 [1] : vector<8x16xf32> to vector<8xf32>
    %177 = vector.shape_cast %176 : vector<8xf32> to vector<8x1xf32>
    %cst_61 = arith.constant dense<0.000000e+00> : vector<1xf32>
    %178 = vector.multi_reduction <add>, %177, %cst_61 [0] : vector<8x1xf32> to vector<1xf32>
    %179 = vector.shape_cast %178 : vector<1xf32> to vector<1x1xf32>
    %cst_62 = arith.constant 1.250000e-01 : f32
    %180 = vector.broadcast %cst_62 : f32 to vector<1x1xf32>
    %181 = arith.mulf %179, %180 : vector<1x1xf32>
    %182 = vector.extract_strided_slice %86 {offsets = [0, 0], sizes = [8, 16], strides = [1, 1]} : vector<8x32xf32> to vector<8x16xf32>
    %183 = vector.extract_strided_slice %86 {offsets = [0, 16], sizes = [8, 16], strides = [1, 1]} : vector<8x32xf32> to vector<8x16xf32>
    %184 = arith.subf %182, %183 : vector<8x16xf32>
    %185 = arith.mulf %184, %184 : vector<8x16xf32>
    %186 = vector.broadcast %11 : vector<8x1xf32> to vector<8x16xf32>
    %187 = arith.mulf %185, %186 : vector<8x16xf32>
    %cst_63 = arith.constant dense<0.000000e+00> : vector<8xf32>
    %188 = vector.multi_reduction <add>, %187, %cst_63 [1] : vector<8x16xf32> to vector<8xf32>
    %189 = vector.shape_cast %188 : vector<8xf32> to vector<8x1xf32>
    %cst_64 = arith.constant dense<0.000000e+00> : vector<1xf32>
    %190 = vector.multi_reduction <add>, %189, %cst_64 [0] : vector<8x1xf32> to vector<1xf32>
    %191 = vector.shape_cast %190 : vector<1xf32> to vector<1x1xf32>
    %cst_65 = arith.constant 5.000000e-01 : f32
    %192 = vector.broadcast %cst_65 : f32 to vector<1x1xf32>
    %193 = arith.mulf %192, %191 : vector<1x1xf32>
    %cst_66 = arith.constant 1.250000e-01 : f32
    %194 = vector.broadcast %cst_66 : f32 to vector<1x1xf32>
    %195 = arith.mulf %193, %194 : vector<1x1xf32>
    %cst_67 = arith.constant 5.000000e+01 : f32
    %196 = vector.broadcast %cst_67 : f32 to vector<1x1xf32>
    %197 = arith.mulf %195, %196 : vector<1x1xf32>
    %198 = arith.addf %158, %181 : vector<1x1xf32>
    %199 = arith.addf %198, %197 : vector<1x1xf32>
    %200 = vector.shape_cast %199 : vector<1x1xf32> to vector<1x1x1xf32>
    %c0_68 = arith.constant 0 : index
    %c0_69 = arith.constant 0 : index
    %c0_70 = arith.constant 0 : index
    %201 = vector.load %arg13[%c0_68, %c0_69, %c0_70] : memref<1x1x1xf32, #tpu.memory_space<vmem>>, vector<1x1x1xf32>
    tpu.vector_store %arg13[%c0_68, %c0_69, %c0_70], %200 {strides = array<i32>} : memref<1x1x1xf32, #tpu.memory_space<vmem>>, vector<1x1x1xf32>,
    %202 = tpu.concatenate %78, %86 in 1 : vector<8x16xf32>, vector<8x32xf32> -> vector<8x48xf32>
    %c0_71 = arith.constant 0 : index
    %c0_72 = arith.constant 0 : index
    %203 = vector.load %arg14[%c0_71, %c0_72] : memref<8x48xf32, #tpu.memory_space<vmem>>, vector<8x48xf32>
    tpu.vector_store %arg14[%c0_71, %c0_72], %202 {strides = array<i32>} : memref<8x48xf32, #tpu.memory_space<vmem>>, vector<8x48xf32>,
    return
  }
  func.func @transform_0(%arg0: i32) -> (i32, i32) {
    %c0_i32 = arith.constant 0 : i32
    %c0_i32_0 = arith.constant 0 : i32
    return %arg0, %c0_i32 : i32, i32
  }
  func.func @transform_1(%arg0: i32) -> (i32, i32) {
    %c0_i32 = arith.constant 0 : i32
    %c0_i32_0 = arith.constant 0 : i32
    return %arg0, %c0_i32 : i32, i32
  }
  func.func @transform_2(%arg0: i32) -> (i32, i32) {
    %c0_i32 = arith.constant 0 : i32
    %c0_i32_0 = arith.constant 0 : i32
    return %arg0, %c0_i32 : i32, i32
  }
  func.func @transform_3(%arg0: i32) -> (i32, i32) {
    %c0_i32 = arith.constant 0 : i32
    %c0_i32_0 = arith.constant 0 : i32
    return %arg0, %c0_i32 : i32, i32
  }
  func.func @transform_4(%arg0: i32) -> (i32, i32) {
    %c0_i32 = arith.constant 0 : i32
    %c0_i32_0 = arith.constant 0 : i32
    %c0_i32_1 = arith.constant 0 : i32
    return %c0_i32, %c0_i32_0 : i32, i32
  }
  func.func @transform_5(%arg0: i32) -> (i32, i32) {
    %c0_i32 = arith.constant 0 : i32
    %c0_i32_0 = arith.constant 0 : i32
    %c0_i32_1 = arith.constant 0 : i32
    return %c0_i32, %c0_i32_0 : i32, i32
  }
  func.func @transform_6(%arg0: i32) -> (i32, i32) {
    %c0_i32 = arith.constant 0 : i32
    %c0_i32_0 = arith.constant 0 : i32
    %c0_i32_1 = arith.constant 0 : i32
    return %c0_i32, %c0_i32_0 : i32, i32
  }
  func.func @transform_7(%arg0: i32) -> (i32, i32) {
    %c0_i32 = arith.constant 0 : i32
    %c0_i32_0 = arith.constant 0 : i32
    %c0_i32_1 = arith.constant 0 : i32
    return %c0_i32, %c0_i32_0 : i32, i32
  }
  func.func @transform_8(%arg0: i32) -> (i32, i32) {
    %c0_i32 = arith.constant 0 : i32
    %c0_i32_0 = arith.constant 0 : i32
    %c0_i32_1 = arith.constant 0 : i32
    return %c0_i32, %c0_i32_0 : i32, i32
  }
  func.func @transform_9(%arg0: i32) -> (i32, i32) {
    %c0_i32 = arith.constant 0 : i32
    %c0_i32_0 = arith.constant 0 : i32
    %c0_i32_1 = arith.constant 0 : i32
    return %c0_i32, %c0_i32_0 : i32, i32
  }
  func.func @transform_10(%arg0: i32) -> (i32, i32) {
    %c0_i32 = arith.constant 0 : i32
    %c0_i32_0 = arith.constant 0 : i32
    %c0_i32_1 = arith.constant 0 : i32
    return %c0_i32, %c0_i32_0 : i32, i32
  }
  func.func @transform_11(%arg0: i32) -> (i32, i32) {
    %c0_i32 = arith.constant 0 : i32
    %c0_i32_0 = arith.constant 0 : i32
    %c0_i32_1 = arith.constant 0 : i32
    return %c0_i32, %c0_i32_0 : i32, i32
  }
  func.func @transform_12(%arg0: i32) -> (i32, i32, i32) {
    %c0_i32 = arith.constant 0 : i32
    %c0_i32_0 = arith.constant 0 : i32
    %c0_i32_1 = arith.constant 0 : i32
    return %arg0, %c0_i32, %c0_i32_0 : i32, i32, i32
  }
  func.func @transform_13(%arg0: i32) -> (i32, i32) {
    %c0_i32 = arith.constant 0 : i32
    %c0_i32_0 = arith.constant 0 : i32
    return %arg0, %c0_i32 : i32, i32
  }
}

</mosaic_0001>

<bundles_post_ra>
// kernel: tpu_custom_call.1
= control target key start
LH: loop header
LB: loop body
LE: loop exit
PB: predicated region body
PF: predicated region fallthrough
CT: control target
= control target key end

     0   :  { %19 = vsyncpa [#allocation3], 0  ;;  %s1309_s0 = inlined_call_operand.hbm [shape: f32[8,48], index: 0, kind: input, shape index: {}]   ;;  %s1310_s1 = inlined_call_operand.hbm [shape: f32[8,48], index: 1, kind: input, shape index: {}]   ;;  %s1311_s2 = inlined_call_operand.vmem [shape: s32[8,1], index: 2, kind: input, shape index: {}]   ;;  %s1312_s3 = inlined_call_operand.hbm [shape: f32[8,32], index: 3, kind: input, shape index: {}]   ;;  %s1313_s4 = inlined_call_operand.hbm [shape: f32[51,80], index: 4, kind: input, shape index: {}]   ;;  %s1314_s5 = inlined_call_operand.vmem [shape: f32[1,80], index: 5, kind: input, shape index: {}]   ;;  %s1315_s6 = inlined_call_operand.hbm [shape: f32[80,96], index: 6, kind: input, shape index: {}]   ;;  %s1316_s7 = inlined_call_operand.vmem [shape: f32[1,96], index: 7, kind: input, shape index: {}]   ;;  %s1317_s8 = inlined_call_operand.vmem [shape: f32[16,48], index: 8, kind: input, shape index: {}]   ;;  %s1318_s9 = inlined_call_operand.vmem [shape: f32[1,48], index: 9, kind: input, shape index: {}]   ;;  %s1319_s10 = inlined_call_operand.hbm [shape: f32[48,51], index: 10, kind: input, shape index: {}]   ;;  %s1320_s11 = inlined_call_operand.vmem [shape: f32[1,51], index: 11, kind: input, shape index: {}]   ;;  %s1321_s12 = inlined_call_operand.hbm [shape: f32[1,1,1], index: 12, kind: output, shape index: {0}]   ;;  %s1322_s13 = inlined_call_operand.hbm [shape: f32[8,48], index: 13, kind: output, shape index: {1}]  }
   0x1   :  { %20 = vsyncpa [#allocation6], 0 }
   0x2   :  { %21 = vsyncpa [#allocation9], 0 }
   0x3   :  { %22 = vsyncpa [#allocation12], 0 }
   0x4   :  { %23 = vsyncpa [#allocation4], 0 }
   0x5   :  { %24 = vsyncpa [#allocation15], 0  ;;  %s1073_s25 = smov [#allocation5]   ;;  %s1074_s27 = smov [#allocation8]  }
   0x6   :  { %s41_s26 = sshll.u32 %s1073_s25, 4  ;;  %s62_s28 = sshll.u32 %s1074_s27, 4  ;;  %s42_s26 = int_to_ptr.vmem [resolvable:$true] %s41_s26  ;;  %s63_s28 = int_to_ptr.vmem [resolvable:$true] %s62_s28 }
   0x7   :  { %s909_s29 = scalar_lea.vmem %s42_s26, 128  ;;  %p914_p1 = scmp.lt.s32.totalorder %s42_s26, %s42_s26 }
   0x8   :  { %p910_p0 = scmp.ne.s32.totalorder %s42_s26, %s909_s29  ;;  %p915_p2 = scmp.lt.s32.totalorder %s909_s29, %s909_s29 }
   0xa   :  { %p916_p3 = por %p915_p2, %p914_p1 }
   0xc   :  { %p917_p4 = pnand %p916_p3, %p910_p0 }
   0xe   :  { %920 = shalt.err (!%p917_p4)
}
   0xf   :  { %44 = dma.hbm_to_vmem [thread:$0]  %s1310_s1, 128, %s42_s26, [#allocation6]  }
  0x10   :  { %s929_s15 = scalar_lea.vmem %s63_s28, 896  ;;  %p934_p6 = scmp.lt.s32.totalorder %s63_s28, %s63_s28 }
  0x11   :  { %p930_p5 = scmp.ne.s32.totalorder %s63_s28, %s929_s15  ;;  %p935_p7 = scmp.lt.s32.totalorder %s929_s15, %s929_s15 }
  0x13   :  { %p936_p8 = por %p935_p7, %p934_p6 }
  0x15   :  { %p937_p9 = pnand %p936_p8, %p930_p5 }
  0x17   :  { %940 = shalt.err (!%p937_p9)
}
  0x18   :  { %s1075_s16 = smov 128   ;;  %s1076_s17 = smov 8  }
  0x19   :  { %68 = dma.hbm_to_vmem [thread:$0]  %s1313_s4, 896, %s63_s28, [#allocation9], %s1075_s16, %s1075_s16, %s1076_s17  }
  0x1a   :  { %s1077_s20 = smov [#allocation2]   ;;  %s1078_s22 = smov [#allocation7]  }
  0x1b   :  { %s31_s21 = sshll.u32 %s1077_s20, 4  ;;  %s53_s1 = sshll.u32 %s1078_s22, 4  ;;  %s32_s21 = int_to_ptr.vmem [resolvable:$true] %s31_s21  ;;  %s54_s1 = int_to_ptr.vmem [resolvable:$true] %s53_s1 }
  0x1c   :  { %s949_s23 = scalar_lea.vmem %s32_s21, 128  ;;  %p954_p11 = scmp.lt.s32.totalorder %s32_s21, %s32_s21 }
  0x1d   :  { %p950_p10 = scmp.ne.s32.totalorder %s32_s21, %s949_s23  ;;  %p955_p12 = scmp.lt.s32.totalorder %s949_s23, %s949_s23 }
  0x1f   :  { %p956_p13 = por %p955_p12, %p954_p11 }
  0x21   :  { %p957_p0 = pnand %p956_p13, %p950_p10 }
  0x23   :  { %960 = shalt.err (!%p957_p0)
}
  0x24   :  { %34 = dma.hbm_to_vmem [thread:$0]  %s1309_s0, 128, %s32_s21, [#allocation3]  }
  0x25   :  { %s969_s26 = scalar_lea.vmem %s54_s1, 128  ;;  %p974_p2 = scmp.lt.s32.totalorder %s54_s1, %s54_s1 }
  0x26   :  { %p970_p1 = scmp.ne.s32.totalorder %s54_s1, %s969_s26  ;;  %p975_p3 = scmp.lt.s32.totalorder %s969_s26, %s969_s26 }
  0x28   :  { %p976_p4 = por %p975_p3, %p974_p2 }
  0x2a   :  { %p977_p5 = pnand %p976_p4, %p970_p1 }
  0x2c   :  { %980 = shalt.err (!%p977_p5)
}
  0x2d   :  { %56 = dma.hbm_to_vmem [thread:$0]  %s1312_s3, 128, %s54_s1, [#allocation6]  }
  0x2e   :  { %s1079_s28 = smov [#allocation10]   ;;  %s1080_s30 = smov [#allocation11]  }
  0x2f   :  { %s76_s29 = sshll.u32 %s1079_s28, 4  ;;  %s94_s14 = sshll.u32 %s1080_s30, 4  ;;  %s77_s29 = int_to_ptr.vmem [resolvable:$true] %s76_s29  ;;  %s95_s14 = int_to_ptr.vmem [resolvable:$true] %s94_s14 }
  0x30   :  { %s989_s15 = scalar_lea.vmem %s77_s29, 1280  ;;  %p994_p7 = scmp.lt.s32.totalorder %s77_s29, %s77_s29 }
  0x31   :  { %p990_p6 = scmp.ne.s32.totalorder %s77_s29, %s989_s15  ;;  %p995_p8 = scmp.lt.s32.totalorder %s989_s15, %s989_s15 }
  0x33   :  { %p996_p9 = por %p995_p8, %p994_p7 }
  0x35   :  { %p997_p10 = pnand %p996_p9, %p990_p6 }
  0x37   :  { %1000 = shalt.err (!%p997_p10)
}
  0x38   :  { %82 = dma.hbm_to_vmem [thread:$0]  %s1315_s6, 1280, %s77_s29, [#allocation9], %s1075_s16, %s1075_s16, %s1076_s17  }
  0x39   :  { %s1009_s3 = scalar_lea.vmem %s95_s14, 768  ;;  %p1014_p12 = scmp.lt.s32.totalorder %s95_s14, %s95_s14 }
  0x3a   :  { %p1010_p11 = scmp.ne.s32.totalorder %s95_s14, %s1009_s3  ;;  %p1015_p13 = scmp.lt.s32.totalorder %s1009_s3, %s1009_s3 }
  0x3c   :  { %p1016_p0 = por %p1015_p13, %p1014_p12 }
  0x3e   :  { %p1017_p1 = pnand %p1016_p0, %p1010_p11 }
  0x40   :  { %1020 = shalt.err (!%p1017_p1)
}
  0x41   :  { %100 = dma.hbm_to_vmem [thread:$0]  %s1319_s10, 768, %s95_s14, [#allocation12], %s1075_s16, %s1075_s16, %s1076_s17  }
  0x42   :  { %1061 = dma.done.wait [#allocation3], 128  }
  0x43   :  { %1062 = vsyncadd [#allocation3], 4294967168 }
  0x44   :  { %1063 = dma.done.wait [#allocation6], 256  }
  0x45   :  { %1064 = vsyncadd [#allocation6], 4294967040 }
  0x46   :  { %1065 = dma.done.wait [#allocation9], 2176  }
  0x47   :  { %1066 = vsyncadd [#allocation9], 4294965120 }
  0x48   :  { %1067 = dma.done.wait [#allocation12], 768  }
  0x49   :  { %1068 = vsyncadd [#allocation12], 4294966528  ;;  %v1081_v0 = vmov 0   ;;  %v1082_v1 = vmov 0.0   ;;  %vm175_vm0 = vcmask 1042432   ;;  %v143_v2 = vld [vmem:[%s1311_s2] sm:$0xff]  ;;  %v141_v10 = vlaneseq }
  0x4a   :  { %872 = vset.pattern.permute.xlu0 %v1081_v0  ;;  %789 = vmatprep.subr.mxu0 %v1082_v1  ;;  %v163_v3 = vld [vmem:[#allocation8 + $0x30] sm:$0x7]  ;;  %v162_v4 = vld [vmem:[#allocation8 + $0x28] sm:$0xff]  ;;  %v161_v5 = vld [vmem:[#allocation8 + $0x20] sm:$0xff]  ;;  %vm1083_vm1 = vmmov 0   ;;  %s1084_s2 = smov 48  }
  0x4b   :  { %806 = vmatprep.subr.mxu1 %v1082_v1  ;;  %145 = vperm.xlu0 %872, %v143_v2   ;;  %v160_v6 = vld [vmem:[#allocation8 + $0x18] sm:$0xff]  ;;  %v159_v7 = vld [vmem:[#allocation8 + $0x10] sm:$0xff]  ;;  %v158_v8 = vld [vmem:[#allocation8 + $0x8] sm:$0xff]  ;;  %v1207_v11 = vand.u32 127, %v141_v10  ;;  %vm155_vm4 = vcmask 392192   ;;  %vm171_vm5 = vcmask 416768  }
  0x4c   :  { %790 = vmatpush3.msk.msra.mxu0 %vm175_vm0, %v163_v3  ;;  %v157_v9 = vld [vmem:[#allocation8] sm:$0xff]  ;;  %803 = vmatprep.mubr.msk.f32.mxu0 %vm1083_vm1, %v1082_v1  ;;  %v1215_v14 = vld [vmem:[#allocation2] sm:$0xff]  ;;  %v1221_v22 = vld [vmem:[#allocation5] sm:$0xff]  ;;  %vm275_vm6 = vcmask 654336   ;;  %s1085_s22 = smov 16   ;;  %s1086_s1 = smov 80  }
  0x4d   :  { %791 = vmatprep.subr.mxu0 %v1082_v1  ;;  %826 = vmatprep.mubr.msk.f32.mxu1 %vm1083_vm1, %v1082_v1  ;;  %v123_v15 = vadd.f32 1.0, %v1215_v14  ;;  %v126_v16 = vmul.f32 -0.5, %v1215_v14  ;;  %v129_v19 = vand.u32 2147483647, %v1215_v14  ;;  %v267_v27 = vld [vmem:[#allocation10 + $0x48] sm:$0xff]  ;;  %v266_v28 = vld [vmem:[#allocation10 + $0x40] sm:$0xff] }
  0x4e   :  { %792 = vmatpush3.msra.mxu0 %v162_v4  ;;  %807 = vmatpush3.msra.mxu1 %v267_v27  ;;  %v265_v29 = vld [vmem:[#allocation10 + $0x38] sm:$0xff]  ;;  %v264_v30 = vld [vmem:[#allocation10 + $0x30] sm:$0xff]  ;;  %v263_v31 = vld [vmem:[#allocation10 + $0x28] sm:$0xff]  ;;  %s1088_s23 = smov 112   ;;  %s1089_s24 = smov 96   ;;  %vm396_vm8 = vcmask 130048  }
  0x4f   :  { %793 = vmatprep.subr.mxu0 %v1082_v1  ;;  %873 = vlog2.f32 %v123_v15  ;;  %v127_v17 = vadd.f32 1.0, %v126_v16  ;;  %vm130_vm3 = vcmp.lt.f32.partialorder %v129_v19, 0.0004427343  ;;  %808 = vmatprep.subr.mxu1 %v1082_v1  ;;  %v262_v32 = vld [vmem:[#allocation10 + $0x20] sm:$0xff]  ;;  %v261_v33 = vld [vmem:[#allocation10 + $0x18] sm:$0xff]  ;;  %v260_v34 = vld [vmem:[#allocation10 + $0x10] sm:$0xff] }
  0x50   :  { %794 = vmatpush3.msra.mxu0 %v161_v5  ;;  %809 = vmatpush3.msra.mxu1 %v266_v28  ;;  %v259_v35 = vld [vmem:[#allocation10 + $0x8] sm:$0xff]  ;;  %v258_v36 = vld [vmem:[#allocation10] sm:$0xff]  ;;  %v751_v37 = vld [vmem:[%s1314_s5] ss:$0 sm:$0xff]  ;;  %s1090_s25 = smov 64   ;;  %vm398_vm9 = vcmask 261120  }
  0x51   :  { %795 = vmatprep.subr.mxu0 %v1082_v1  ;;  %v128_v21 = vmul.f32 %v127_v17, %v1215_v14  ;;  %810 = vmatprep.subr.mxu1 %v1082_v1  ;;  %v754_v50 = vld [vmem:[%s1316_s7] ss:$0 sm:$0xff]  ;;  %s1087_s7 = smov 32   ;;  %vm633_vm10 = vcmask 417152   ;;  %vm644_vm11 = vcmask 23552   ;;  %vm612_vm14 = vcmp.gt.f32.partialorder %v1215_v14, 1.0 }
  0x52   :  { %796 = vmatpush3.msra.mxu0 %v160_v6  ;;  %811 = vmatpush3.msra.mxu1 %v265_v29  ;;  %v526_v29 = vld [vmem:[#allocation11 + $0x28] sm:$0xff]  ;;  %vm675_vm15 = vcmp.lt.s32.totalorder %v1207_v11, 10 }
  0x53   :  { %797 = vmatprep.subr.mxu0 %v1082_v1  ;;  %812 = vmatprep.subr.mxu1 %v1082_v1 }
  0x54   :  { %798 = vmatpush3.msra.mxu0 %v159_v7  ;;  %813 = vmatpush3.msra.mxu1 %v264_v30  ;;  %v431_v7 = vld [vmem:[%s1317_s8 + $0x8] sm:$0xff]  ;;  %v525_v30 = vld [vmem:[#allocation11 + $0x20] sm:$0xff] }
  0x55   :  { %799 = vmatprep.subr.mxu0 %v1082_v1  ;;  %814 = vmatprep.subr.mxu1 %v1082_v1 }
  0x56   :  { %800 = vmatpush3.msra.mxu0 %v158_v8  ;;  %815 = vmatpush3.msra.mxu1 %v263_v31  ;;  %v430_v8 = vld [vmem:[%s1317_s8] sm:$0xff]  ;;  %v524_v31 = vld [vmem:[#allocation11 + $0x18] sm:$0xff] }
  0x57   :  { %801 = vmatprep.subr.mxu0 %v1082_v1  ;;  %816 = vmatprep.subr.mxu1 %v1082_v1 }
  0x58   :  { %802 = vmatpush3.msra.mxu0 %v157_v9  ;;  %817 = vmatpush3.msra.mxu1 %v262_v32  ;;  %v523_v32 = vld [vmem:[#allocation11 + $0x10] sm:$0xff] }
  0x59   :  { %836 = vmatprep.subr.mxu0 %v1082_v1  ;;  %818 = vmatprep.subr.mxu1 %v1082_v1 }
  0x5a   :  { %819 = vmatpush3.msra.mxu1 %v261_v33  ;;  %v522_v33 = vld [vmem:[#allocation11 + $0x8] sm:$0xff] }
  0x5b   :  { %820 = vmatprep.subr.mxu1 %v1082_v1 }
  0x5c   :  { %v874_v18 = vpop.eup %873  ;;  %821 = vmatpush3.msra.mxu1 %v260_v34  ;;  %v521_v34 = vld [vmem:[#allocation11] sm:$0xff] }
  0x5d   :  { %v125_v20 = vmul.f32 0.6931472, %v874_v18  ;;  %822 = vmatprep.subr.mxu1 %v1082_v1 }
  0x5e   :  { %823 = vmatpush3.msra.mxu1 %v259_v35  ;;  %v756_v35 = vld [vmem:[%s1318_s9] ss:$0 sm:$0xff]  ;;  %s1092_s9 = smov [#allocation14]  }
  0x5f   :  { %v131_v23 = vsel %vm130_vm3, %v128_v21, %v125_v20  ;;  %824 = vmatprep.subr.mxu1 %v1082_v1 }
  0x60   :  { %v132_v24 = vmul.f32 %v131_v23, %v1221_v22  ;;  %825 = vmatpush3.msra.mxu1 %v258_v36 }
  0x61   :  { %829 = vmatprep.subr.mxu1 %v1082_v1 }
  0xc6   :  { %v146_v12 = vpop.permute.xlu0 %145 }
  0xc7   :  { %vm147_vm2 = vcmp.eq.s32.totalorder %v1207_v11, %v146_v12 }
  0xc8   :  { %v1211_v13 = vsel %vm147_vm2, 1.0, %v1082_v1 }
  0xc9   :  { %152 = vrot.lane.b32.xlu0 %v1211_v13, %s1084_s2 }
 0x13b   :  { %v153_v25 = vpop.permute.xlu0 %152 }
 0x13c   :  { %v156_v26 = vsel %vm155_vm4, %v132_v24, %v153_v25 }
 0x13d   :  { %804 = vmatmul.mubr.msk.f32.vlgmr.msra.gmra.mxu0 %vm171_vm5, %v156_v26 }
 0x13e   :  { %848 = vmatprep.mubr.msk.f32.mxu0 %vm1083_vm1, %v1082_v1  ;;  %837 = vmatpush3.msra.mxu0 %v526_v29 }
 0x13f   :  { %838 = vmatprep.subr.mxu0 %v1082_v1 }
 0x140   :  { %839 = vmatpush3.msra.mxu0 %v525_v30 }
 0x141   :  { %840 = vmatprep.subr.mxu0 %v1082_v1 }
 0x142   :  { %841 = vmatpush3.msra.mxu0 %v524_v31 }
 0x143   :  { %842 = vmatprep.subr.mxu0 %v1082_v1 }
 0x144   :  { %843 = vmatpush3.msra.mxu0 %v523_v32 }
 0x145   :  { %844 = vmatprep.subr.mxu0 %v1082_v1 }
 0x146   :  { %845 = vmatpush3.msra.mxu0 %v522_v33 }
 0x147   :  { %846 = vmatprep.subr.mxu0 %v1082_v1 }
 0x148   :  { %847 = vmatpush3.msra.mxu0 %v521_v34 }
 0x1fd   :  { %v245_v38 = vpop.f32.mrf.mxu0 }
 0x1fe   :  { %v246_v39 = vadd.f32 %v751_v37, %v245_v38 }
 0x1ff   :  { %v805_v40 = vpop.f32.mrf.mxu0 }
 0x200   :  { %v249_v41 = vmin.f32 %v246_v39, 20.0 }
 0x202   :  { %v250_v42 = vmul.f32 1.442695, %v249_v41 }
 0x204   :  { %875 = vpow2.f32 %v250_v42 }
 0x211   :  { %v876_v43 = vpop.eup %875 }
 0x212   :  { %v252_v44 = vadd.f32 2.0, %v876_v43 }
 0x214   :  { %v253_v45 = vmul.f32 %v876_v43, %v252_v44 }
 0x216   :  { %v254_v46 = vadd.f32 2.0, %v253_v45 }
 0x218   :  { %877 = vrcp.f32 %v254_v46 }
 0x225   :  { %v878_v47 = vpop.eup %877 }
 0x226   :  { %v256_v48 = vmul.f32 %v878_v47, %v253_v45  ;;  %v758_v47 = vld [vmem:[%s1320_s11] ss:$0 sm:$0xff]  ;;  %s734_s11 = sshll.u32 %s1092_s9, 4  ;;  %s735_s11 = int_to_ptr.vmem [resolvable:$true] %s734_s11 }
 0x227   :  { %s1021_s15 = scalar_lea.vmem %s735_s11, 128  ;;  %p1026_p3 = scmp.lt.s32.totalorder %s735_s11, %s735_s11 }
 0x228   :  { %v257_v49 = vmul.f32 %v256_v48, %v246_v39  ;;  %p1022_p2 = scmp.ne.s32.totalorder %s735_s11, %s1021_s15  ;;  %p1027_p4 = scmp.lt.s32.totalorder %s1021_s15, %s1021_s15 }
 0x22a   :  { %827 = vmatmul.mubr.msk.f32.vlgmr.msra.gmra.mxu1 %vm275_vm6, %v257_v49  ;;  %p1028_p5 = por %p1027_p4, %p1026_p3 }
 0x22b   :  { %833 = vmatprep.mubr.msk.f32.mxu1 %vm1083_vm1, %v1082_v1  ;;  %830 = vmatpush3.msra.mxu1 %v431_v7 }
 0x22c   :  { %831 = vmatprep.subr.mxu1 %v1082_v1  ;;  %p1029_p6 = pnand %p1028_p5, %p1022_p2 }
 0x22d   :  { %832 = vmatpush3.msra.mxu1 %v430_v8 }
 0x2ea   :  { %v345_v51 = vpop.f32.mrf.mxu1 }
 0x2eb   :  { %v346_v52 = vadd.f32 %v754_v50, %v345_v51 }
 0x2ec   :  { %v828_v53 = vpop.f32.mrf.mxu1 }
 0x2ed   :  { %v349_v54 = vsub.f32 0.0, %v346_v52 }
 0x2ef   :  { %v350_v55 = vand.u32 2147483647, %v349_v54  ;;  %vm354_vm7 = vcmp.lt.f32.partialorder %v349_v54, 0.0 }
 0x2f1   :  { %v351_v56 = vsub.f32 0.0, %v350_v55 }
 0x2f3   :  { %v352_v57 = vmul.f32 1.442695, %v351_v56  ;;  %v423_v56 = vld [vmem:[#allocation7] sm:$0xff] }
 0x2f5   :  { %879 = vpow2.f32 %v352_v57 }
 0x302   :  { %v880_v58 = vpop.eup %879 }
 0x303   :  { %v355_v59 = vadd.f32 1e-12, %v880_v58 }
 0x305   :  { %881 = vrcp.f32 %v355_v59 }
 0x312   :  { %v882_v60 = vpop.eup %881 }
 0x313   :  { %v358_v61 = vsel %vm354_vm7, %v880_v58, %v882_v60 }
 0x314   :  { %369 = vrot.lane.b32.xlu0 %v358_v61, %s1085_s22  ;;  %360 = vrot.lane.b32.xlu1 %v358_v61, %s1086_s1  ;;  %v364_v0 = vadd.f32 1.0, %v358_v61 }
 0x318   :  { %365 = vrot.lane.b32.xlu1 %v358_v61, %s1087_s7 }
 0x386   :  { %v361_v62 = vpop.permute.xlu1 %360  ;;  %v370_v4 = vpop.permute.xlu0 %369 }
 0x387   :  { %v363_v63 = vmul.f32 %v361_v62, %v346_v52  ;;  %v372_v6 = vadd.f32 %v370_v4, %v364_v0 }
 0x389   :  { %379 = vrot.lane.b32.xlu0 %v363_v63, %s1088_s23  ;;  %375 = vrot.lane.b32.xlu1 %v363_v63, %s1089_s24 }
 0x38a   :  { %v366_v2 = vpop.permute.xlu1 %365 }
 0x38b   :  { %v368_v3 = vadd.f32 %v366_v2, %v364_v0 }
 0x38d   :  { %v373_v5 = vadd.f32 %v370_v4, %v368_v3  ;;  %389 = vrot.lane.b32.xlu0 %v368_v3, %s1090_s25 }
 0x38f   :  { %385 = vrot.lane.b32.xlu1 %v373_v5, %s1084_s2 }
 0x393   :  { %393 = vrot.lane.b32.xlu1 %v372_v6, %s1086_s1 }
 0x3fb   :  { %v380_v9 = vpop.permute.xlu0 %379  ;;  %v376_v10 = vpop.permute.xlu1 %375 }
 0x3fc   :  { %v382_v12 = vadd.f32 %v380_v9, %v363_v63  ;;  %v378_v15 = vadd.f32 %v376_v10, %v363_v63  ;;  %v613_v10 = vsel %vm612_vm14, %v1215_v14, 2.0 }
 0x3fe   :  { %v383_v16 = vadd.f32 %v380_v9, %v378_v15  ;;  %401 = vrot.lane.b32.xlu0 %v378_v15, %s1085_s22  ;;  %405 = vrot.lane.b32.xlu1 %v382_v12, %s1085_s22 }
 0x3ff   :  { %v390_v19 = vpop.permute.xlu0 %389 }
 0x401   :  { %v386_v17 = vpop.permute.xlu1 %385 }
 0x402   :  { %v397_v20 = vsel %vm396_vm8, %v386_v17, %v390_v19 }
 0x405   :  { %v394_v18 = vpop.permute.xlu1 %393 }
 0x406   :  { %v399_v21 = vsel %vm398_vm9, %v397_v20, %v394_v18 }
 0x407   :  { %883 = vrcp.f32 %v399_v21 }
 0x414   :  { %v884_v26 = vpop.eup %883 }
 0x415   :  { %v413_v57 = vadd.f32 1e-12, %v884_v26 }
 0x417   :  { %vm418_vm12 = vcmp.eq.f32.partialorder %v413_v57, inf  ;;  %v421_v63 = vand.u32 2147483648, %v413_v57  ;;  %vm420_vm13 = vcmp.eq.f32.partialorder %v413_v57, 0.0 }
 0x470   :  { %v402_v23 = vpop.permute.xlu0 %401  ;;  %v406_v24 = vpop.permute.xlu1 %405 }
 0x471   :  { %v408_v25 = vsel %vm396_vm8, %v383_v16, %v402_v23 }
 0x472   :  { %v409_v27 = vsel %vm398_vm9, %v408_v25, %v406_v24 }
 0x473   :  { %v1261_v28 = vmul.f32 %v884_v26, %v409_v27 }
 0x475   :  { %834 = vmatmul.mubr.msk.f32.vlgmr.msra.gmra.mxu1 %vm396_vm8, %v1261_v28 }
 0x535   :  { %v508_v36 = vpop.f32.mrf.mxu1 }
 0x536   :  { %v509_v37 = vadd.f32 %v756_v35, %v508_v36 }
 0x537   :  { %v835_v38 = vpop.f32.mrf.mxu1 }
 0x538   :  { %v512_v39 = vmin.f32 %v509_v37, 20.0 }
 0x53a   :  { %v513_v40 = vmul.f32 1.442695, %v512_v39  ;;  %v671_v39 = vmul.f32 %v1261_v28, %v1261_v28 }
 0x53c   :  { %885 = vpow2.f32 %v513_v40 }
 0x549   :  { %v886_v41 = vpop.eup %885 }
 0x54a   :  { %v515_v42 = vadd.f32 2.0, %v886_v41 }
 0x54c   :  { %v516_v43 = vmul.f32 %v886_v41, %v515_v42 }
 0x54e   :  { %v517_v44 = vadd.f32 2.0, %v516_v43 }
 0x550   :  { %887 = vrcp.f32 %v517_v44  ;;  %v1091_v44 = vmov 5.0  }
 0x55d   :  { %v888_v45 = vpop.eup %887 }
 0x55e   :  { %v519_v46 = vmul.f32 %v888_v45, %v516_v43  ;;  %v676_v45 = vsel %vm675_vm15, 1.0, %v1091_v44 }
 0x560   :  { %v520_v1 = vmul.f32 %v519_v46, %v509_v37 }
 0x562   :  { %849 = vmatmul.mubr.msk.f32.vlgmr.msra.gmra.mxu0 %vm155_vm4, %v520_v1 }
 0x622   :  { %v603_v48 = vpop.f32.mrf.mxu0 }
 0x623   :  { %v604_v49 = vadd.f32 %v758_v47, %v603_v48 }
 0x624   :  { %v850_v50 = vpop.f32.mrf.mxu0 }
 0x625   :  { %v634_v51 = vsel %vm633_vm10, %v604_v49, -inf  ;;  %v608_v18 = vmul.f32 1.442695, %v604_v49  ;;  %v610_v29 = vmul.f32 %v604_v49, %v1215_v14 }
 0x626   :  { %635 = vmax.xlane.f32.xlu0 %v634_v51 }
 0x6af   :  { %v636_v52 = vpop.xlane.xlu0 %635 }
 0x6b0   :  { %v637_v53 = vsub.f32 %v604_v49, %v636_v52 }
 0x6b2   :  { %v638_v54 = vmul.f32 1.442695, %v637_v53 }
 0x6b4   :  { %889 = vpow2.f32 %v638_v54 }
 0x6b5   :  { %891 = vrsqrt.f32 %v413_v57 }
 0x6c1   :  { %v890_v55 = vpop.eup %889 }
 0x6c2   :  { %641 = vrot.lane.b32.xlu1 %v890_v55, %s1086_s1  ;;  %v892_v58 = vpop.eup %891 }
 0x6c3   :  { %v417_v59 = vmul.f32 %v892_v58, %v413_v57 }
 0x6c5   :  { %v419_v62 = vsel %vm418_vm12, %v413_v57, %v417_v59 }
 0x6c6   :  { %425 = vrot.lane.b32.xlu1 %v423_v56, %s1085_s22  ;;  %v422_v0 = vsel %vm420_vm13, %v421_v63, %v419_v62 }
 0x734   :  { %v642_v60 = vpop.permute.xlu1 %641 }
 0x735   :  { %v645_v61 = vsel %vm644_vm11, %v642_v60, 0.0 }
 0x736   :  { %646 = vadd.xlane.f32.xlu1 %v645_v61 }
 0x738   :  { %v426_v2 = vpop.permute.xlu1 %425 }
 0x739   :  { %v428_v3 = vmul.f32 %v426_v2, %v422_v0 }
 0x73b   :  { %v429_v4 = vadd.f32 %v428_v3, %v1261_v28 }
 0x73d   :  { %690 = vrot.lane.b32.xlu0 %v429_v4, %s1088_s23  ;;  %v716_v5 = vsel %vm396_vm8, %v1261_v28, %v429_v4 }
 0x73e   :  { %717 = vst.msk [vmem:[#allocation14] sm:$0xff] %vm155_vm4, %v716_v5 }
 0x7af   :  { %v691_v6 = vpop.permute.xlu0 %690 }
 0x7b0   :  { %v693_v7 = vsub.f32 %v429_v4, %v691_v6 }
 0x7b2   :  { %v694_v8 = vmul.f32 %v693_v7, %v693_v7 }
 0x7b4   :  { %697 = vrot.lane.b32.xlu0 %v694_v8, %s1088_s23 }
 0x7bf   :  { %v647_v9 = vpop.xlane.xlu1 %646 }
 0x7c0   :  { %893 = vlog2.f32 %v647_v9 }
 0x7c1   :  { %895 = vlog2.f32 %v613_v10 }
 0x7c2   :  { %897 = vpow2.f32 %v608_v18 }
 0x7c3   :  { %899 = vlog2.f32 %v413_v57 }
 0x7cd   :  { %v894_v12 = vpop.eup %893 }
 0x7ce   :  { %v649_v15 = vmul.f32 0.6931472, %v894_v12  ;;  %v896_v19 = vpop.eup %895 }
 0x7cf   :  { %v615_v20 = vmul.f32 0.6931472, %v896_v19  ;;  %v898_v26 = vpop.eup %897 }
 0x7d0   :  { %v650_v16 = vadd.f32 %v649_v15, %v636_v52  ;;  %v611_v30 = vsub.f32 %v898_v26, %v610_v29  ;;  %v900_v37 = vpop.eup %899 }
 0x7d1   :  { %v616_v21 = vmul.f32 %v615_v20, %v613_v10  ;;  %v618_v23 = vadd.f32 1.837877, %v615_v20  ;;  %v415_v38 = vmul.f32 0.6931472, %v900_v37 }
 0x7d2   :  { %v652_v17 = vsub.f32 %v604_v49, %v650_v16 }
 0x7d3   :  { %v617_v24 = vsub.f32 %v616_v21, %v613_v10  ;;  %v619_v25 = vmul.f32 0.5, %v618_v23  ;;  %v670_v40 = vadd.f32 1.0, %v415_v38 }
 0x7d4   :  { %654 = vrot.lane.b32.xlu1 %v652_v17, %s1086_s1 }
 0x7d5   :  { %v620_v27 = vadd.f32 %v619_v25, %v617_v24  ;;  %v672_v41 = vsub.f32 %v670_v40, %v671_v39 }
 0x7d7   :  { %v621_v31 = vsel %vm612_vm14, %v620_v27, 0.0  ;;  %v673_v14 = vsub.f32 %v672_v41, %v413_v57 }
 0x7d8   :  { %v622_v32 = vadd.f32 %v621_v31, %v611_v30 }
 0x7d9   :  { %v674_v42 = vmul.f32 -0.5, %v673_v14 }
 0x7da   :  { %v623_v33 = vmul.f32 %v622_v32, %v1221_v22  ;;  %v651_v22 = vsub.f32 0.0, %v1211_v13 }
 0x7db   :  { %v677_v47 = vmul.f32 %v676_v45, %v674_v42 }
 0x7dc   :  { %v624_v34 = vsel %vm155_vm4, %v623_v33, 0.0 }
 0x7dd   :  { %v679_v48 = vsel %vm396_vm8, %v677_v47, 0.0 }
 0x7f8   :  { %625 = vadd.xlane.f32.xlu1 %v624_v34 }
 0x826   :  { %v698_v35 = vpop.permute.xlu0 %697 }
 0x827   :  { %v700_v36 = vsel %vm396_vm8, %v698_v35, 0.0 }
 0x828   :  { %701 = vadd.xlane.f32.xlu0 %v700_v36 }
 0x846   :  { %v655_v43 = vpop.permute.xlu1 %654 }
 0x847   :  { %v657_v46 = vmul.f32 %v655_v43, %v651_v22 }
 0x849   :  { %v658_v1 = vsel %vm644_vm11, %v657_v46, 0.0 }
 0x84a   :  { %659 = vadd.xlane.f32.xlu0 %v658_v1 }
 0x84e   :  { %680 = vadd.xlane.f32.xlu0 %v679_v48 }
 0x84f   :  { %1032 = shalt.err (!%p1029_p6)
}
 0x850   :  { %737 = dma.vmem_to_hbm [thread:$0]  %s735_s11, 128, %s1322_s13, [#allocation15]   ;;  %vm714_vm0 = vcmask 0  }
 0x851   :  { %s1093_s13 = smov [#allocation13]  }
 0x852   :  { %s724_s3 = sshll.u32 %s1093_s13, 4  ;;  %s725_s3 = int_to_ptr.vmem [resolvable:$true] %s724_s3 }
 0x853   :  { %s1041_s19 = scalar_lea.vmem %s725_s3, 16  ;;  %s1045_s20 = scalar_lea.vmem %s725_s3, 32 }
 0x854   :  { %p1042_p7 = scmp.ne.s32.totalorder %s725_s3, %s1041_s19  ;;  %p1046_p8 = scmp.lt.s32.totalorder %s725_s3, %s725_s3 }
 0x855   :  { %p1047_p9 = scmp.lt.s32.totalorder %s1045_s20, %s1041_s19 }
 0x857   :  { %p1048_p10 = por %p1047_p9, %p1046_p8 }
 0x859   :  { %p1049_p11 = pnand %p1048_p10, %p1042_p7 }
 0x881   :  { %v626_v28 = vpop.xlane.xlu1 %625 }
 0x882   :  { %v627_v50 = vrot.slane %v626_v28, 4 }
 0x884   :  { %v628_v52 = vadd.f32 %v627_v50, %v626_v28 }
 0x886   :  { %v629_v55 = vrot.slane %v628_v52, 2 }
 0x888   :  { %v630_v60 = vadd.f32 %v629_v55, %v628_v52 }
 0x88a   :  { %v631_v3 = vrot.slane %v630_v60, 1 }
 0x88c   :  { %v632_v9 = vadd.f32 %v631_v3, %v630_v60 }
 0x8b1   :  { %v702_v11 = vpop.xlane.xlu0 %701 }
 0x8b2   :  { %v703_v13 = vrot.slane %v702_v11, 4 }
 0x8b4   :  { %v704_v49 = vadd.f32 %v703_v13, %v702_v11 }
 0x8b6   :  { %v705_v51 = vrot.slane %v704_v49, 2 }
 0x8b8   :  { %v706_v53 = vadd.f32 %v705_v51, %v704_v49 }
 0x8ba   :  { %v707_v57 = vrot.slane %v706_v53, 1 }
 0x8bc   :  { %v708_v63 = vadd.f32 %v707_v57, %v706_v53 }
 0x8be   :  { %v709_v6 = vmul.f32 0.5, %v708_v63 }
 0x8c0   :  { %v710_v15 = vmul.f32 0.125, %v709_v6 }
 0x8c2   :  { %v711_v20 = vmul.f32 50.0, %v710_v15 }
 0x8d3   :  { %v660_v54 = vpop.xlane.xlu0 %659 }
 0x8d4   :  { %v661_v56 = vrot.slane %v660_v54, 4 }
 0x8d6   :  { %v662_v58 = vadd.f32 %v661_v56, %v660_v54 }
 0x8d7   :  { %v681_v59 = vpop.xlane.xlu0 %680 }
 0x8d8   :  { %v663_v61 = vrot.slane %v662_v58, 2  ;;  %v682_v62 = vrot.slane %v681_v59, 4 }
 0x8da   :  { %v664_v0 = vadd.f32 %v663_v61, %v662_v58  ;;  %v683_v2 = vadd.f32 %v682_v62, %v681_v59 }
 0x8dc   :  { %v665_v4 = vrot.slane %v664_v0, 1  ;;  %v684_v5 = vrot.slane %v683_v2, 2 }
 0x8de   :  { %v666_v7 = vadd.f32 %v665_v4, %v664_v0  ;;  %v685_v8 = vadd.f32 %v684_v5, %v683_v2 }
 0x8e0   :  { %v667_v10 = vmul.f32 1004.0, %v666_v7  ;;  %v686_v12 = vrot.slane %v685_v8, 1 }
 0x8e2   :  { %v668_v16 = vadd.f32 %v667_v10, %v632_v9  ;;  %v687_v17 = vadd.f32 %v686_v12, %v685_v8 }
 0x8e4   :  { %v669_v18 = vmul.f32 0.125, %v668_v16  ;;  %v688_v19 = vmul.f32 0.125, %v687_v17 }
 0x8e6   :  { %v712_v21 = vadd.f32 %v688_v19, %v669_v18 }
 0x8e8   :  { %v713_v23 = vadd.f32 %v712_v21, %v711_v20 }
 0x8ea   :  { %715 = vst.msk [vmem:[#allocation13] sm:$0x1] %vm714_vm0, %v713_v23 }
 0x8eb   :  { %1052 = shalt.err (!%p1049_p11)
}
 0x8ec   :  { %727 = dma.vmem_to_hbm [thread:$0]  %s725_s3, 16, %s1321_s12, [#allocation4]  }
 0x8ed   :  { %1069 = dma.done.wait [#allocation4], 16  }
 0x8ee   :  { %1070 = vsyncadd [#allocation4], 4294967280 }
 0x8ef   :  { %1071 = dma.done.wait [#allocation15], 128  }
 0x8f0   :  { %1072 = vsyncadd [#allocation15], 4294967168 }
 0x8f1   :  { %744 = vsyncpa [#allocation3], 1 }
 0x8f2   :  { %745 = vsyncpa [#allocation6], 1 }
 0x8f3   :  { %746 = vsyncpa [#allocation9], 1 }
 0x8f4   :  { %747 = vsyncpa [#allocation12], 1 }
 0x8f5   :  { %748 = vsyncpa [#allocation4], 1 }
 0x8f6   :  { %749 = vsyncpa [#allocation15], 1 }

</bundles_post_ra>
